<compile_context>
chip_gen: v6e
topology: v6e:2x2x1
jax: 0.10.0
libtpu: 0.0.40
codegen_flags: <defaults>
</compile_context>

<pallas_src>
import functools

import jax
import jax.numpy as jnp
from jax.experimental import pallas as pl
from jax.experimental.pallas import tpu as pltpu

LANES = 128
SUBLANES = 8
MAX_TILE_ROWS = 1024   # (1024, 128) f32 tile = 512 KiB; well inside v5e/v7x VMEM budgets
NUM_SHARDS = 2         # leading "parallel" axis (megacore on v7x; serial loop elsewhere)


def _logmae_kernel(pred_ref, target_ref, sum_ref, cnt_ref, *,
                   tile_rows, tiles_per_shard, total_rows):
    c = pl.program_id(0)   # shard (parallel)
    i = pl.program_id(1)   # tile within shard (arbitrary / reduction)

    @pl.when(i == 0)
    def _():
        sum_ref[...] = jnp.zeros_like(sum_ref)
        cnt_ref[...] = jnp.zeros_like(cnt_ref)

    # Logical (unclamped) block index; the input index_map clamps the DMA to
    # stay in-bounds, and we mask any rows past the true array extent here.
    block_idx = c * tiles_per_shard + i
    row0 = block_idx * tile_rows
    local_row = jax.lax.broadcasted_iota(jnp.int32, (tile_rows, LANES), 0)
    in_bounds = (row0 + local_row) < total_rows

    t = target_ref[...]
    p = pred_ref[...]
    valid = jnp.logical_and(t > 0, in_bounds)

    # Substitute 1.0 for masked entries so log() stays finite there; the error
    # contribution is then exactly 0 (log(1) - log(1)).
    pf = jnp.where(valid, p.astype(jnp.float32), 1.0)
    tf = jnp.where(valid, t.astype(jnp.float32), 1.0)
    err = jnp.abs(jnp.log(pf) - jnp.log(tf))
    cnt = valid.astype(jnp.float32)

    # Sublane-fold the tile into a single (8, 128) vreg and accumulate (VPU only).
    folds = tile_rows // SUBLANES
    sum_ref[...] += err.reshape(folds, SUBLANES, LANES).sum(axis=0)
    cnt_ref[...] += cnt.reshape(folds, SUBLANES, LANES).sum(axis=0)


def log_mae(pred, target):
    """Pallas implementation of LogMAE.forward(pred, target)."""
    assert pred.shape == target.shape
    n = pred.size

    rows = -(-n // LANES)
    total_rows = max(SUBLANES, -(-rows // SUBLANES) * SUBLANES)
    padded = total_rows * LANES

    pred_flat = pred.reshape(-1)
    target_flat = target.reshape(-1)
    if padded != n:
        # TODO(synk): only reached when n % 1024 != 0; this pad materializes a
        # copy.  Common depth-map shapes (incl. the test) take the zero-copy path.
        pred_flat = jnp.pad(pred_flat, (0, padded - n))
        target_flat = jnp.pad(target_flat, (0, padded - n))  # zeros -> target==0 -> masked
    p2d = pred_flat.reshape(total_rows, LANES)    # zero-copy (row-major bitcast)
    t2d = target_flat.reshape(total_rows, LANES)

    tile_rows = min(MAX_TILE_ROWS, total_rows)
    tiles_total = -(-total_rows // tile_rows)
    num_shards = min(NUM_SHARDS, tiles_total)
    tiles_per_shard = -(-tiles_total // num_shards)
    last_block = tiles_total - 1

    def in_map(c, i):
        # Clamp so the DMA never reads past the array; the kernel masks by the
        # unclamped logical index, so clamped re-reads contribute nothing.
        return (jnp.minimum(c * tiles_per_shard + i, last_block), 0)

    kernel = functools.partial(
        _logmae_kernel,
        tile_rows=tile_rows,
        tiles_per_shard=tiles_per_shard,
        total_rows=total_rows,
    )

    sum_out, cnt_out = pl.pallas_call(
        kernel,
        out_shape=(
            jax.ShapeDtypeStruct((num_shards * SUBLANES, LANES), jnp.float32),
            jax.ShapeDtypeStruct((num_shards * SUBLANES, LANES), jnp.float32),
        ),
        grid_spec=pltpu.PrefetchScalarGridSpec(
            num_scalar_prefetch=0,
            grid=(num_shards, tiles_per_shard),
            in_specs=[
                pl.BlockSpec((tile_rows, LANES), in_map),
                pl.BlockSpec((tile_rows, LANES), in_map),
            ],
            out_specs=[
                pl.BlockSpec((SUBLANES, LANES), lambda c, i: (c, 0)),
                pl.BlockSpec((SUBLANES, LANES), lambda c, i: (c, 0)),
            ],
        ),
        compiler_params=pltpu.CompilerParams(
            dimension_semantics=("parallel", "arbitrary")),
    )(p2d, t2d)

    total = jnp.sum(sum_out)
    num_pixels = jnp.sum(cnt_out)
    # Matches: if num_pixels < 10: return -1 else mean(log_err)
    return jnp.where(num_pixels < 10.0,
                     jnp.float32(-1.0),
                     total / jnp.maximum(num_pixels, 1.0))


def _reference(pred, target):
    mask = target > 0
    num = jnp.sum(mask)
    safe_p = jnp.where(mask, pred, 1.0)
    safe_t = jnp.where(mask, target, 1.0)
    err = jnp.where(mask, jnp.abs(jnp.log(safe_p) - jnp.log(safe_t)), 0.0)
    return jnp.where(num < 10, -1.0, jnp.sum(err) / jnp.maximum(num, 1))


if __name__ == "__main__":
    key = jax.random.PRNGKey(0)
    k1, k2 = jax.random.split(key)

    B, C, H, W = 2, 4, 16, 16  # NCHW, small synthetic depth maps
    pred = jax.random.uniform(k1, (B, C, H, W), jnp.float32,
                              minval=0.1, maxval=10.0)
    # target: positive depths with ~30% invalid (<= 0) pixels
    depth = jax.random.uniform(k2, (B, C, H, W), jnp.float32,
                               minval=0.1, maxval=10.0)
    invalid = jax.random.uniform(key, (B, C, H, W)) < 0.3
    target = jnp.where(invalid, 0.0, depth)

    out = log_mae(pred, target)
    jax.block_until_ready(out)

    ref = _reference(pred, target)
    assert jnp.allclose(out, ref, rtol=1e-5, atol=1e-6), (out, ref)

    print("KERNEL_OK")
</pallas_src>

<mosaic_0001>
module attributes {stable_mosaic.version = 11 : i64} {
  func.func @_logmae_kernel(%arg0: i32, %arg1: i32, %arg2: memref<16x128xf32, #tpu.memory_space<vmem>>, %arg3: memref<16x128xf32, #tpu.memory_space<vmem>>, %arg4: memref<8x128xf32, #tpu.memory_space<vmem>>, %arg5: memref<8x128xf32, #tpu.memory_space<vmem>>) attributes {dimension_semantics = [#tpu.dimension_semantics<parallel>, #tpu.dimension_semantics<arbitrary>], iteration_bounds = array<i64: 1, 1>, scalar_prefetch = 0 : i64, scratch_operands = 0 : i64, tpu.core_type = #tpu.core_type<tc>, window_params = [{transform_indices = @transform_0, window_bounds = array<i64: 16, 128>}, {transform_indices = @transform_1, window_bounds = array<i64: 16, 128>}, {transform_indices = @transform_2, window_bounds = array<i64: 8, 128>}, {transform_indices = @transform_3, window_bounds = array<i64: 8, 128>}]} {
    %c0_i32 = arith.constant 0 : i32
    %0 = arith.cmpi eq, %arg1, %c0_i32 : i32
    %1 = arith.extui %0 : i1 to i32
    %c0_i32_0 = arith.constant 0 : i32
    %2 = arith.cmpi ne, %1, %c0_i32_0 : i32
    scf.if %2 {
      %cst_17 = arith.constant 0.000000e+00 : f32
      %36 = vector.broadcast %cst_17 : f32 to vector<8x128xf32>
      %c0_18 = arith.constant 0 : index
      %c0_19 = arith.constant 0 : index
      %37 = vector.load %arg4[%c0_18, %c0_19] : memref<8x128xf32, #tpu.memory_space<vmem>>, vector<8x128xf32>
      tpu.vector_store %arg4[%c0_18, %c0_19], %36 {strides = array<i32>} : memref<8x128xf32, #tpu.memory_space<vmem>>, vector<8x128xf32>,
      %cst_20 = arith.constant 0.000000e+00 : f32
      %38 = vector.broadcast %cst_20 : f32 to vector<8x128xf32>
      %c0_21 = arith.constant 0 : index
      %c0_22 = arith.constant 0 : index
      %39 = vector.load %arg5[%c0_21, %c0_22] : memref<8x128xf32, #tpu.memory_space<vmem>>, vector<8x128xf32>
      tpu.vector_store %arg5[%c0_21, %c0_22], %38 {strides = array<i32>} : memref<8x128xf32, #tpu.memory_space<vmem>>, vector<8x128xf32>,
    } else {
    }
    %c1_i32 = arith.constant 1 : i32
    %3 = arith.muli %arg0, %c1_i32 : i32
    %4 = arith.addi %3, %arg1 : i32
    %c16_i32 = arith.constant 16 : i32
    %5 = arith.muli %4, %c16_i32 : i32
    %6 = tpu.iota {dimensions = array<i32: 0>} : vector<16x128xi32>
    %7 = vector.broadcast %5 : i32 to vector<16x128xi32>
    %8 = arith.addi %7, %6 : vector<16x128xi32>
    %c16_i32_1 = arith.constant 16 : i32
    %9 = vector.broadcast %c16_i32_1 : i32 to vector<16x128xi32>
    %10 = arith.cmpi slt, %8, %9 : vector<16x128xi32>
    %c0 = arith.constant 0 : index
    %c0_2 = arith.constant 0 : index
    %11 = vector.load %arg3[%c0, %c0_2] : memref<16x128xf32, #tpu.memory_space<vmem>>, vector<16x128xf32>
    %c0_3 = arith.constant 0 : index
    %c0_4 = arith.constant 0 : index
    %12 = vector.load %arg2[%c0_3, %c0_4] : memref<16x128xf32, #tpu.memory_space<vmem>>, vector<16x128xf32>
    %cst = arith.constant 0.000000e+00 : f32
    %13 = vector.broadcast %cst : f32 to vector<16x128xf32>
    %14 = arith.cmpf ogt, %11, %13 : vector<16x128xf32>
    %15 = arith.andi %14, %10 : vector<16x128xi1>
    %cst_5 = arith.constant 1.000000e+00 : f32
    %16 = vector.broadcast %cst_5 : f32 to vector<16x128xf32>
    %17 = arith.select %15, %12, %16 : vector<16x128xi1>, vector<16x128xf32>
    %cst_6 = arith.constant 1.000000e+00 : f32
    %18 = vector.broadcast %cst_6 : f32 to vector<16x128xf32>
    %19 = arith.select %15, %11, %18 : vector<16x128xi1>, vector<16x128xf32>
    %20 = math.log %17 : vector<16x128xf32>
    %21 = math.log %19 : vector<16x128xf32>
    %22 = arith.subf %20, %21 : vector<16x128xf32>
    %23 = math.absf %22 : vector<16x128xf32>
    %24 = arith.extui %15 : vector<16x128xi1> to vector<16x128xi32>
    %25 = arith.sitofp %24 : vector<16x128xi32> to vector<16x128xf32>
    %c0_7 = arith.constant 0 : index
    %c0_8 = arith.constant 0 : index
    %26 = vector.load %arg4[%c0_7, %c0_8] : memref<8x128xf32, #tpu.memory_space<vmem>>, vector<8x128xf32>
    %27 = vector.shape_cast %23 : vector<16x128xf32> to vector<2x8x128xf32>
    %cst_9 = arith.constant dense<0.000000e+00> : vector<8x128xf32>
    %28 = vector.multi_reduction <add>, %27, %cst_9 [0] : vector<2x8x128xf32> to vector<8x128xf32>
    %29 = arith.addf %26, %28 : vector<8x128xf32>
    %c0_10 = arith.constant 0 : index
    %c0_11 = arith.constant 0 : index
    %30 = vector.load %arg4[%c0_10, %c0_11] : memref<8x128xf32, #tpu.memory_space<vmem>>, vector<8x128xf32>
    tpu.vector_store %arg4[%c0_10, %c0_11], %29 {strides = array<i32>} : memref<8x128xf32, #tpu.memory_space<vmem>>, vector<8x128xf32>,
    %c0_12 = arith.constant 0 : index
    %c0_13 = arith.constant 0 : index
    %31 = vector.load %arg5[%c0_12, %c0_13] : memref<8x128xf32, #tpu.memory_space<vmem>>, vector<8x128xf32>
    %32 = vector.shape_cast %25 : vector<16x128xf32> to vector<2x8x128xf32>
    %cst_14 = arith.constant dense<0.000000e+00> : vector<8x128xf32>
    %33 = vector.multi_reduction <add>, %32, %cst_14 [0] : vector<2x8x128xf32> to vector<8x128xf32>
    %34 = arith.addf %31, %33 : vector<8x128xf32>
    %c0_15 = arith.constant 0 : index
    %c0_16 = arith.constant 0 : index
    %35 = vector.load %arg5[%c0_15, %c0_16] : memref<8x128xf32, #tpu.memory_space<vmem>>, vector<8x128xf32>
    tpu.vector_store %arg5[%c0_15, %c0_16], %34 {strides = array<i32>} : memref<8x128xf32, #tpu.memory_space<vmem>>, vector<8x128xf32>,
    return
  }
  func.func @transform_0(%arg0: i32, %arg1: i32) -> (i32, i32) {
    %c1_i32 = arith.constant 1 : i32
    %0 = arith.muli %arg0, %c1_i32 : i32
    %1 = arith.addi %0, %arg1 : i32
    %c0_i32 = arith.constant 0 : i32
    %2 = arith.minsi %1, %c0_i32 : i32
    %c0_i32_0 = arith.constant 0 : i32
    %c0_i32_1 = arith.constant 0 : i32
    return %2, %c0_i32_0 : i32, i32
  }
  func.func @transform_1(%arg0: i32, %arg1: i32) -> (i32, i32) {
    %c1_i32 = arith.constant 1 : i32
    %0 = arith.muli %arg0, %c1_i32 : i32
    %1 = arith.addi %0, %arg1 : i32
    %c0_i32 = arith.constant 0 : i32
    %2 = arith.minsi %1, %c0_i32 : i32
    %c0_i32_0 = arith.constant 0 : i32
    %c0_i32_1 = arith.constant 0 : i32
    return %2, %c0_i32_0 : i32, i32
  }
  func.func @transform_2(%arg0: i32, %arg1: i32) -> (i32, i32) {
    %c0_i32 = arith.constant 0 : i32
    %c0_i32_0 = arith.constant 0 : i32
    return %arg0, %c0_i32 : i32, i32
  }
  func.func @transform_3(%arg0: i32, %arg1: i32) -> (i32, i32) {
    %c0_i32 = arith.constant 0 : i32
    %c0_i32_0 = arith.constant 0 : i32
    return %arg0, %c0_i32 : i32, i32
  }
}

</mosaic_0001>

<bundles_post_ra>
// kernel: tpu_custom_call.1
= control target key start
LH: loop header
LB: loop body
LE: loop exit
PB: predicated region body
PF: predicated region fallthrough
CT: control target
= control target key end

     0   :  { %9 = vsyncpa [#allocation3], 0  ;;  %s293_s0 = inlined_call_operand.hbm [shape: f32[16,128], index: 0, kind: input, shape index: {}]   ;;  %s294_s1 = inlined_call_operand.hbm [shape: f32[16,128], index: 1, kind: input, shape index: {}]   ;;  %s295_s2 = inlined_call_operand.hbm [shape: f32[8,128], index: 2, kind: output, shape index: {0}]   ;;  %s296_s3 = inlined_call_operand.hbm [shape: f32[8,128], index: 3, kind: output, shape index: {1}]  }
   0x1   :  { %10 = vsyncpa [#allocation6], 0 }
   0x2   :  { %11 = vsyncpa [#allocation4], 0 }
   0x3   :  { %12 = vsyncpa [#allocation9], 0  ;;  %s254_s12 = smov [#allocation2]  }
   0x4   :  { %s24_s13 = sshll.u32 %s254_s12, 4  ;;  %s25_s13 = int_to_ptr.vmem [resolvable:$true] %s24_s13 }
   0x5   :  { %s174_s14 = scalar_lea.vmem %s25_s13, 256  ;;  %p179_p1 = scmp.lt.s32.totalorder %s25_s13, %s25_s13 }
   0x6   :  { %p175_p0 = scmp.ne.s32.totalorder %s25_s13, %s174_s14  ;;  %p180_p2 = scmp.lt.s32.totalorder %s174_s14, %s174_s14 }
   0x8   :  { %p181_p3 = por %p180_p2, %p179_p1 }
   0xa   :  { %p182_p4 = pnand %p181_p3, %p175_p0 }
   0xc   :  { %185 = shalt.err (!%p182_p4)
}
   0xd   :  { %s255_s15 = smov 128   ;;  %s256_s16 = smov 8  }
   0xe   :  { %30 = dma.hbm_to_vmem [thread:$0]  %s293_s0, 256, %s25_s13, [#allocation3], %s255_s15, %s255_s15, %s256_s16  }
   0xf   :  { %s257_s19 = smov [#allocation5]  }
  0x10   :  { %s42_s20 = sshll.u32 %s257_s19, 4  ;;  %s43_s20 = int_to_ptr.vmem [resolvable:$true] %s42_s20 }
  0x11   :  { %s194_s21 = scalar_lea.vmem %s43_s20, 256  ;;  %p199_p6 = scmp.lt.s32.totalorder %s43_s20, %s43_s20 }
  0x12   :  { %p195_p5 = scmp.ne.s32.totalorder %s43_s20, %s194_s21  ;;  %p200_p7 = scmp.lt.s32.totalorder %s194_s21, %s194_s21 }
  0x14   :  { %p201_p8 = por %p200_p7, %p199_p6 }
  0x16   :  { %p202_p9 = pnand %p201_p8, %p195_p5 }
  0x18   :  { %205 = shalt.err (!%p202_p9)
}
  0x19   :  { %48 = dma.hbm_to_vmem [thread:$0]  %s294_s1, 256, %s43_s20, [#allocation6], %s255_s15, %s255_s15, %s256_s16  }
  0x1a   :  { %246 = dma.done.wait [#allocation3], 256  }
  0x1b   :  { %247 = vsyncadd [#allocation3], 4294967040 }
  0x1c   :  { %248 = dma.done.wait [#allocation6], 256  }
  0x1d   :  { %249 = vsyncadd [#allocation6], 4294967040  ;;  %v79_v0 = vld [vmem:[#allocation5] sm:$0xff]  ;;  %v80_v1 = vld [vmem:[#allocation5 + $0x8] sm:$0xff]  ;;  %v258_v8 = vmov 0.0   ;;  %s259_s0 = smov [#allocation8]  }
  0x1e   :  { %v81_v2 = vld [vmem:[#allocation2] sm:$0xff]  ;;  %v82_v3 = vld [vmem:[#allocation2 + $0x8] sm:$0xff]  ;;  %vm83_vm0 = vcmp.gt.f32.partialorder %v79_v0, 0.0  ;;  %vm84_vm1 = vcmp.gt.f32.partialorder %v80_v1, 0.0  ;;  %s131_s1 = sshll.u32 %s259_s0, 4  ;;  %s132_s1 = int_to_ptr.vmem [resolvable:$true] %s131_s1 }
  0x1f   :  { %v87_v4 = vsel %vm83_vm0, %v81_v2, 1.0  ;;  %v88_v5 = vsel %vm84_vm1, %v82_v3, 1.0  ;;  %v89_v6 = vsel %vm83_vm0, %v79_v0, 1.0  ;;  %v90_v7 = vsel %vm84_vm1, %v80_v1, 1.0  ;;  %s206_s24 = scalar_lea.vmem %s132_s1, 128  ;;  %p211_p11 = scmp.lt.s32.totalorder %s132_s1, %s132_s1 }
  0x20   :  { %158 = vlog2.f32 %v87_v4  ;;  %v149_v9 = vsel %vm83_vm0, 1.0, %v258_v8  ;;  %v150_v10 = vsel %vm84_vm1, 1.0, %v258_v8  ;;  %p207_p10 = scmp.ne.s32.totalorder %s132_s1, %s206_s24  ;;  %p212_p12 = scmp.lt.s32.totalorder %s206_s24, %s206_s24 }
  0x21   :  { %160 = vlog2.f32 %v88_v5  ;;  %v112_v11 = vadd.f32 %v150_v10, %v149_v9 }
  0x22   :  { %162 = vlog2.f32 %v89_v6  ;;  %p213_p13 = por %p212_p12, %p211_p11 }
  0x23   :  { %164 = vlog2.f32 %v90_v7  ;;  %114 = vst [vmem:[#allocation8] sm:$0xff] %v112_v11 }
  0x24   :  { %p214_p0 = pnand %p213_p13, %p207_p10 }
  0x26   :  { %217 = shalt.err (!%p214_p0)
}
  0x27   :  { %134 = dma.vmem_to_hbm [thread:$0]  %s132_s1, 128, %s296_s3, [#allocation9]  }
  0x28   :  { %s260_s27 = smov [#allocation7]  }
  0x29   :  { %s121_s28 = sshll.u32 %s260_s27, 4  ;;  %s122_s28 = int_to_ptr.vmem [resolvable:$true] %s121_s28 }
  0x2a   :  { %s226_s29 = scalar_lea.vmem %s122_s28, 128  ;;  %p231_p2 = scmp.lt.s32.totalorder %s122_s28, %s122_s28 }
  0x2b   :  { %p227_p1 = scmp.ne.s32.totalorder %s122_s28, %s226_s29  ;;  %p232_p3 = scmp.lt.s32.totalorder %s226_s29, %s226_s29 }
  0x2d   :  { %v159_v12 = vpop.eup %158  ;;  %p233_p4 = por %p232_p3, %p231_p2 }
  0x2e   :  { %v161_v13 = vpop.eup %160  ;;  %v92_v14 = vmul.f32 0.6931472, %v159_v12 }
  0x2f   :  { %v163_v15 = vpop.eup %162  ;;  %v94_v16 = vmul.f32 0.6931472, %v161_v13  ;;  %p234_p5 = pnand %p233_p4, %p227_p1 }
  0x30   :  { %v165_v17 = vpop.eup %164  ;;  %v96_v18 = vmul.f32 0.6931472, %v163_v15 }
  0x31   :  { %v98_v19 = vmul.f32 0.6931472, %v165_v17 }
  0x32   :  { %v99_v20 = vsub.f32 %v92_v14, %v96_v18 }
  0x33   :  { %v100_v21 = vsub.f32 %v94_v16, %v98_v19 }
  0x34   :  { %v101_v22 = vand.u32 2147483647, %v99_v20 }
  0x35   :  { %v102_v23 = vand.u32 2147483647, %v100_v21 }
  0x37   :  { %v108_v24 = vadd.f32 %v102_v23, %v101_v22 }
  0x39   :  { %110 = vst [vmem:[#allocation7] sm:$0xff] %v108_v24 }
  0x3a   :  { %237 = shalt.err (!%p234_p5)
}
  0x3b   :  { %124 = dma.vmem_to_hbm [thread:$0]  %s122_s28, 128, %s295_s2, [#allocation4]  }
  0x3c   :  { %250 = dma.done.wait [#allocation4], 128  }
  0x3d   :  { %251 = vsyncadd [#allocation4], 4294967168 }
  0x3e   :  { %252 = dma.done.wait [#allocation9], 128  }
  0x3f   :  { %253 = vsyncadd [#allocation9], 4294967168 }
  0x40   :  { %141 = vsyncpa [#allocation3], 1 }
  0x41   :  { %142 = vsyncpa [#allocation6], 1 }
  0x42   :  { %143 = vsyncpa [#allocation4], 1 }
  0x43   :  { %144 = vsyncpa [#allocation9], 1 }

</bundles_post_ra>
